<compile_context>
chip_gen: v6e
topology: v6e:2x2x1
jax: 0.10.0
libtpu: 0.0.40
codegen_flags: <defaults>
</compile_context>

<pallas_src>
import math

import jax
import jax.numpy as jnp
from jax.experimental import pallas as pl
from jax.experimental.pallas import tpu as pltpu


def _pe_add_kernel(x_ref, pe_ref, o_ref):
    # x_ref: (tile_rows, tile_cols); pe_ref: (pe_rows, tile_cols).
    x = x_ref[...]
    pe = pe_ref[...]
    tr, cols = x.shape
    prows = pe.shape[0]
    if tr == prows:
        o_ref[...] = x + pe
    else:
        # tile_rows is always a multiple of pe_rows (= sublane count), so the
        # reshape splits exactly on sublane-tile boundaries (layout-free) and
        # the broadcast over the leading dim simply reuses the same pe vregs
        # -> vreg-to-vreg VPU add, no per-step sublane broadcast.
        o_ref[...] = (x.reshape(tr // prows, prows, cols) + pe[None, :, :]).reshape(tr, cols)


def make_pe_buffer(d_model: int, maxlen: int = 5000) -> jnp.ndarray:
    """Build the fixed positional-encoding buffer exactly like the PyTorch __init__."""
    pos = jnp.arange(maxlen, dtype=jnp.float32)[:, None]                   # (maxlen, 1)
    div_term = 10000.0 * jnp.exp(
        jnp.arange(0, d_model, 2, dtype=jnp.float32) / float(d_model))     # (d_model//2,)
    sin_part = jnp.sin(pos / div_term)                                     # (maxlen, d//2)
    cos_part = jnp.cos(pos / div_term)                                     # (maxlen, d//2)
    # interleave: even columns <- sin, odd columns <- cos
    pe = jnp.stack([sin_part, cos_part], axis=-1).reshape(maxlen, d_model)
    return pe.astype(jnp.float32)


def _sublanes(dtype) -> int:
    # Rows per sublane-packed vreg tile: 8 (f32), 16 (bf16/f16), 32 (int8/fp8).
    return max(8, 32 // jnp.dtype(dtype).itemsize)


def _pick_tile_rows(rows_f, tile_cols, itemsize, sub, target_block_bytes, min_blocks):
    if rows_f <= sub:
        return rows_f                                   # full-extent block (allowed)
    budget_rows = max(sub, target_block_bytes // (tile_cols * itemsize))
    cap = rows_f
    if min_blocks > 1 and rows_f >= min_blocks * sub:
        cap = (rows_f // min_blocks // sub) * sub       # >= min_blocks grid steps
    limit = min(budget_rows, cap, rows_f)
    limit = max(sub, (limit // sub) * sub)              # sublane-packing aligned
    # Prefer a tile that divides rows_f exactly (no masked ragged tail).
    t = limit
    while t >= sub:
        if rows_f % t == 0:
            return t
        t -= sub
    return limit                                        # ragged tail handled by cdiv grid


def positional_encoding_fixed_forward(
    x: jnp.ndarray,
    pe: jnp.ndarray,
    dropout_rate: float = 0.1,          # eval mode -> identity
    *,
    use_pallas: bool | None = None,     # None = auto (skip Pallas for tiny inputs)
    target_block_bytes: int = 8 << 20,  # ~8 MiB x-block; working set ~<40 MiB VMEM
    alias_x_to_out: bool = False,       # optional in-place write (caller donates x)
) -> jnp.ndarray:
    """Eval-mode forward: x + pe[x.shape[1], :] (dropout is identity in eval)."""
    # TODO(synk): training-mode dropout (stochastic masking) not implemented;
    # if ever needed, fuse pltpu.prng_seed/prng_random_bits into this kernel.
    B, S, D = x.shape
    maxlen = pe.shape[0]
    if S >= maxlen:
        raise ValueError(f"seq_len {S} out of range for pe buffer (maxlen={maxlen})")

    # Exact PyTorch indexing: single row at index S, cast to x.dtype.
    pe_row = pe[S, :].astype(x.dtype).reshape(1, D)

    total_rows = B * S
    itemsize = jnp.dtype(x.dtype).itemsize

    # Tiny inputs: launch/DMA-setup overhead dominates; XLA's fused add wins.
    if use_pallas is None:
        use_pallas = (total_rows * D * itemsize) > (4 << 20)
    if not use_pallas:
        return x + pe_row.reshape(D)

    sub = _sublanes(x.dtype)

    # ---- lane-dense folding: make the Pallas last dim a multiple of 128 ----
    if D % 128 == 0:
        k = 1
    else:
        k = 128 // math.gcd(D, 128)
    main_rows = (total_rows // k) * k
    x2 = x.reshape(total_rows, D)

    if main_rows == 0:
        # Fewer rows than the fold factor: just do the trivial XLA add.
        return (x2 + pe_row).reshape(B, S, D)

    rows_f = main_rows // k
    cols_f = k * D                                     # always a multiple of 128
    x_f = x2[:main_rows].reshape(rows_f, cols_f)

    # ---- column tiling guard for very wide (folded) rows --------------------
    budget_cols = max(128, ((target_block_bytes // max(1, sub * itemsize)) // 128) * 128)
    if cols_f <= budget_cols:
        tile_cols = cols_f
    else:
        n_lanes = cols_f // 128
        best = 1
        for d in range(1, n_lanes + 1):
            if n_lanes % d == 0 and d * 128 <= budget_cols:
                best = d
        tile_cols = best * 128

    # ---- row tile: large, sublane-aligned, exact divisor, >=2 blocks if big --
    min_blocks = 2 if (rows_f * cols_f * itemsize) >= (4 << 20) else 1
    tile_rows = _pick_tile_rows(rows_f, tile_cols, itemsize, sub,
                                target_block_bytes, min_blocks)

    pe_rows = sub if (tile_rows % sub == 0) else tile_rows
    pe_f = jnp.tile(pe_row, (pe_rows, k))              # (pe_rows, cols_f), resident

    grid = (pl.cdiv(rows_f, tile_rows), pl.cdiv(cols_f, tile_cols))

    # VMEM budget: double-buffered in + out blocks, pe blocks, plus headroom;
    # capped at 48 MiB so it stays safe under v7x's 64 MiB physical VMEM.
    block_bytes = tile_rows * tile_cols * itemsize
    pe_block_bytes = pe_rows * tile_cols * itemsize
    vmem_limit = int(min(max(4 * block_bytes + 2 * pe_block_bytes + (4 << 20),
                             16 << 20), 48 << 20))

    io_aliases = {0: 0} if (alias_x_to_out and main_rows == total_rows) else {}

    main_out = pl.pallas_call(
        _pe_add_kernel,
        out_shape=jax.ShapeDtypeStruct((rows_f, cols_f), x.dtype),
        grid=grid,
        in_specs=[
            pl.BlockSpec((tile_rows, tile_cols), lambda i, j: (i, j)),   # x slab
            pl.BlockSpec((pe_rows, tile_cols), lambda i, j: (0, j)),     # pe block
        ],
        out_specs=pl.BlockSpec((tile_rows, tile_cols), lambda i, j: (i, j)),
        compiler_params=pltpu.CompilerParams(
            dimension_semantics=("parallel", "parallel"),
            vmem_limit_bytes=vmem_limit),
        input_output_aliases=io_aliases,
    )(x_f, pe_f)

    main_out = main_out.reshape(main_rows, D)
    if main_rows == total_rows:
        out2 = main_out
    else:
        # Tiny (< k rows) remainder: plain XLA add keeps the Pallas output
        # lane-dense instead of falling back to a <128-lane masked-store path.
        rem_out = x2[main_rows:] + pe_row
        out2 = jnp.concatenate([main_out, rem_out], axis=0)
    return out2.reshape(B, S, D)


if __name__ == "__main__":
    maxlen = 5000
    dropout = 0.1  # eval mode -> identity
    key = jax.random.PRNGKey(0)
    k1, k2, k3, k4 = jax.random.split(key, 4)

    # --- test 1: module-consistent small shape (forces the Pallas path) -----
    d_model, batch, seq = 32, 2, 8
    x = jax.random.normal(k1, (batch, seq, d_model), dtype=jnp.float32)
    pe = make_pe_buffer(d_model, maxlen)
    out = positional_encoding_fixed_forward(x, pe, dropout_rate=dropout,
                                            use_pallas=True)
    out = jax.block_until_ready(out)
    ref = x + pe[seq, :]
    assert out.shape == (batch, seq, d_model)
    assert jnp.allclose(out, ref, atol=1e-6), "mismatch vs reference (test 1)"

    # --- test 2: non-128-multiple d_model, multi-step grid, divisor tiles ---
    d2, b2, s2 = 96, 2, 256
    x2 = jax.random.normal(k2, (b2, s2, d2), dtype=jnp.float32)
    pe2 = make_pe_buffer(d2, maxlen)
    out2 = positional_encoding_fixed_forward(
        x2, pe2, dropout_rate=dropout, use_pallas=True,
        target_block_bytes=64 << 10)      # small block -> exercises grid > 1
    out2 = jax.block_until_ready(out2)
    ref2 = x2 + pe2[s2, :]
    assert jnp.allclose(out2, ref2, atol=1e-6), "mismatch vs reference (test 2)"

    # --- test 3: remainder path (total_rows not a multiple of fold factor) --
    d3, b3, s3 = 96, 3, 7
    x3 = jax.random.normal(k3, (b3, s3, d3), dtype=jnp.float32)
    pe3 = make_pe_buffer(d3, maxlen)
    out3 = positional_encoding_fixed_forward(x3, pe3, dropout_rate=dropout,
                                             use_pallas=True)
    out3 = jax.block_until_ready(out3)
    ref3 = x3 + pe3[s3, :]
    assert jnp.allclose(out3, ref3, atol=1e-6), "mismatch vs reference (test 3)"

    # --- test 4: bf16 input, 16-row sublane packing --------------------------
    d4, b4, s4 = 128, 2, 64
    x4 = jax.random.normal(k4, (b4, s4, d4), dtype=jnp.float32).astype(jnp.bfloat16)
    pe4 = make_pe_buffer(d4, maxlen)
    out4 = positional_encoding_fixed_forward(x4, pe4, dropout_rate=dropout,
                                             use_pallas=True)
    out4 = jax.block_until_ready(out4)
    ref4 = x4 + pe4[s4, :].astype(jnp.bfloat16)
    assert jnp.allclose(out4.astype(jnp.float32), ref4.astype(jnp.float32),
                        atol=1e-2), "mismatch vs reference (test 4)"

    print("KERNEL_OK")
</pallas_src>

<mosaic_0001>
module attributes {stable_mosaic.version = 11 : i64} {
  func.func @_pe_add_kernel(%arg0: i32, %arg1: i32, %arg2: memref<4x128xf32, #tpu.memory_space<vmem>>, %arg3: memref<4x128xf32, #tpu.memory_space<vmem>>, %arg4: memref<4x128xf32, #tpu.memory_space<vmem>>) attributes {dimension_semantics = [#tpu.dimension_semantics<parallel>, #tpu.dimension_semantics<parallel>], iteration_bounds = array<i64: 1, 1>, scalar_prefetch = 0 : i64, scratch_operands = 0 : i64, tpu.core_type = #tpu.core_type<tc>, window_params = [{transform_indices = @transform_0, window_bounds = array<i64: 4, 128>}, {transform_indices = @transform_1, window_bounds = array<i64: 4, 128>}, {transform_indices = @transform_2, window_bounds = array<i64: 4, 128>}]} {
    %c0 = arith.constant 0 : index
    %c0_0 = arith.constant 0 : index
    %0 = vector.load %arg2[%c0, %c0_0] : memref<4x128xf32, #tpu.memory_space<vmem>>, vector<4x128xf32>
    %c0_1 = arith.constant 0 : index
    %c0_2 = arith.constant 0 : index
    %1 = vector.load %arg3[%c0_1, %c0_2] : memref<4x128xf32, #tpu.memory_space<vmem>>, vector<4x128xf32>
    %2 = arith.addf %0, %1 : vector<4x128xf32>
    %c0_3 = arith.constant 0 : index
    %c0_4 = arith.constant 0 : index
    %3 = vector.load %arg4[%c0_3, %c0_4] : memref<4x128xf32, #tpu.memory_space<vmem>>, vector<4x128xf32>
    tpu.vector_store %arg4[%c0_3, %c0_4], %2 {strides = array<i32>} : memref<4x128xf32, #tpu.memory_space<vmem>>, vector<4x128xf32>,
    return
  }
  func.func @transform_0(%arg0: i32, %arg1: i32) -> (i32, i32) {
    %c0_i32 = arith.constant 0 : i32
    return %arg0, %arg1 : i32, i32
  }
  func.func @transform_1(%arg0: i32, %arg1: i32) -> (i32, i32) {
    %c0_i32 = arith.constant 0 : i32
    %c0_i32_0 = arith.constant 0 : i32
    return %c0_i32, %arg1 : i32, i32
  }
  func.func @transform_2(%arg0: i32, %arg1: i32) -> (i32, i32) {
    %c0_i32 = arith.constant 0 : i32
    return %arg0, %arg1 : i32, i32
  }
}

</mosaic_0001>

<bundles_post_ra>
// kernel: tpu_custom_call.1
= control target key start
LH: loop header
LB: loop body
LE: loop exit
PB: predicated region body
PF: predicated region fallthrough
CT: control target
= control target key end

     0   :  { %7 = vsyncpa [#allocation3], 0  ;;  %s152_s0 = inlined_call_operand.hbm [shape: f32[4,128], index: 0, kind: input, shape index: {}]   ;;  %s153_s1 = inlined_call_operand.hbm [shape: f32[4,128], index: 1, kind: input, shape index: {}]   ;;  %s154_s2 = inlined_call_operand.hbm [shape: f32[4,128], index: 2, kind: output, shape index: {}]  }
   0x1   :  { %8 = vsyncpa [#allocation6], 0 }
   0x2   :  { %9 = vsyncpa [#allocation4], 0  ;;  %s125_s9 = smov [#allocation2]   ;;  %s126_s11 = smov [#allocation5]  }
   0x3   :  { %s16_s10 = sshll.u32 %s125_s9, 4  ;;  %s26_s12 = sshll.u32 %s126_s11, 4  ;;  %s17_s10 = int_to_ptr.vmem [resolvable:$true] %s16_s10  ;;  %s27_s12 = int_to_ptr.vmem [resolvable:$true] %s26_s12 }
   0x4   :  { %s67_s13 = scalar_lea.vmem %s17_s10, 64  ;;  %p72_p1 = scmp.lt.s32.totalorder %s17_s10, %s17_s10 }
   0x5   :  { %p68_p0 = scmp.ne.s32.totalorder %s17_s10, %s67_s13  ;;  %p73_p2 = scmp.lt.s32.totalorder %s67_s13, %s67_s13 }
   0x7   :  { %p74_p3 = por %p73_p2, %p72_p1 }
   0x9   :  { %p75_p4 = pnand %p74_p3, %p68_p0 }
   0xb   :  { %78 = shalt.err (!%p75_p4)
}
   0xc   :  { %19 = dma.hbm_to_vmem [thread:$0]  %s152_s0, 64, %s17_s10, [#allocation3]  }
   0xd   :  { %s87_s16 = scalar_lea.vmem %s27_s12, 64  ;;  %p92_p6 = scmp.lt.s32.totalorder %s27_s12, %s27_s12 }
   0xe   :  { %p88_p5 = scmp.ne.s32.totalorder %s27_s12, %s87_s16  ;;  %p93_p7 = scmp.lt.s32.totalorder %s87_s16, %s87_s16 }
  0x10   :  { %p94_p8 = por %p93_p7, %p92_p6 }
  0x12   :  { %p95_p9 = pnand %p94_p8, %p88_p5 }
  0x14   :  { %98 = shalt.err (!%p95_p9)
}
  0x15   :  { %29 = dma.hbm_to_vmem [thread:$0]  %s153_s1, 64, %s27_s12, [#allocation6]  }
  0x16   :  { %119 = dma.done.wait [#allocation3], 64  }
  0x17   :  { %120 = vsyncadd [#allocation3], 4294967232 }
  0x18   :  { %121 = dma.done.wait [#allocation6], 64  }
  0x19   :  { %122 = vsyncadd [#allocation6], 4294967232  ;;  %s127_s19 = smov [#allocation7]   ;;  %v36_v0 = vld [vmem:[#allocation2] sm:$0xf] }
  0x1a   :  { %s46_s20 = sshll.u32 %s127_s19, 4  ;;  %v37_v1 = vld [vmem:[#allocation5] sm:$0xf]  ;;  %s47_s20 = int_to_ptr.vmem [resolvable:$true] %s46_s20 }
  0x1b   :  { %v38_v2 = vadd.f32 %v37_v1, %v36_v0  ;;  %s99_s0 = scalar_lea.vmem %s47_s20, 64  ;;  %p104_p11 = scmp.lt.s32.totalorder %s47_s20, %s47_s20 }
  0x1c   :  { %p100_p10 = scmp.ne.s32.totalorder %s47_s20, %s99_s0  ;;  %p105_p12 = scmp.lt.s32.totalorder %s99_s0, %s99_s0 }
  0x1d   :  { %39 = vst [vmem:[#allocation7] sm:$0xf] %v38_v2 }
  0x1e   :  { %p106_p13 = por %p105_p12, %p104_p11 }
  0x20   :  { %p107_p0 = pnand %p106_p13, %p100_p10 }
  0x22   :  { %110 = shalt.err (!%p107_p0)
}
  0x23   :  { %49 = dma.vmem_to_hbm [thread:$0]  %s47_s20, 64, %s154_s2, [#allocation4]  }
  0x24   :  { %123 = dma.done.wait [#allocation4], 64  }
  0x25   :  { %124 = vsyncadd [#allocation4], 4294967232 }
  0x26   :  { %53 = vsyncpa [#allocation3], 1 }
  0x27   :  { %54 = vsyncpa [#allocation6], 1 }
  0x28   :  { %55 = vsyncpa [#allocation4], 1 }

</bundles_post_ra>
